<compile_context>
chip_gen: v6e
topology: v6e:2x2x1
jax: 0.10.0
libtpu: 0.0.40
codegen_flags: <defaults>
</compile_context>

<pallas_src>
import functools

import jax
import jax.numpy as jnp
from jax.experimental import pallas as pl
from jax.experimental.pallas import tpu as pltpu

HIDDEN = 128   # MuZero latent width (fixed by the module)
R1 = 64        # representation hidden width (fixed by the module)
NEG_BIG = -1e30


def _round_up(x, m):
    return ((x + m - 1) // m) * m


# ----------------------------------------------------------------------------
# Pallas kernel: whole MuZero forward (representation + dynamics + prediction)
#   3 serially-dependent MXU passes:
#     (TM,S)x(S,128) -> relu -> (TM,128)x(128,128) -> relu -> (TM,128)x(128,256)
# ----------------------------------------------------------------------------
def _muzero_kernel(
    # activations (tiled over the batch grid)
    state_ref, action_ref,
    # weights / biases (resident in VMEM, constant index_map)
    w_r1_ref, b_r1_ref,            # padded representation layer 1 (S,128)/(1,128)
    w_fold_ref, w_da_ref, b_fold_ref,  # folded rep-L2+dyn-L1 (128,128)/(1,128)/(1,128)
    w_cat_ref, b_cat_ref,          # fused dyn-L2 + heads (128,256)/(1,256)
    # outputs (lane-dense slabs)
    hidden_ref, heads_ref,
    *, action_size,
):
    f32 = jnp.float32
    bf16 = jnp.bfloat16

    state = state_ref[...].astype(bf16)       # (TM, S)
    action = action_ref[...]                  # (TM, 1) f32

    # --- layer 1: Linear(S,64)->ReLU, zero-padded to 128 lanes ---------------
    h1 = jnp.dot(state, w_r1_ref[...], preferred_element_type=f32) + b_r1_ref[...]
    h1 = jnp.maximum(h1, 0.0)                  # (TM, 128), lanes [64,128) are 0

    # --- folded (rep layer-2 ∘ dynamics layer-1) + action row + ReLU ---------
    d1 = (jnp.dot(h1.astype(bf16), w_fold_ref[...], preferred_element_type=f32)
          + action * w_da_ref[...]             # (TM,1) * (1,128) broadcast (VPU)
          + b_fold_ref[...])
    d1 = jnp.maximum(d1, 0.0)                  # (TM, 128)

    # --- fused dynamics layer-2 + heads: one (128,256) MXU pass --------------
    out = jnp.dot(d1.astype(bf16), w_cat_ref[...], preferred_element_type=f32) \
        + b_cat_ref[...]                       # (TM, 256)
    hidden2 = out[:, :HIDDEN]                  # dynamics_state output
    heads = out[:, HIDDEN:]                    # [policy logits | value | reward | pad]

    lane = jax.lax.broadcasted_iota(jnp.int32, heads.shape, 1)
    is_policy = lane < action_size

    # softmax over the policy lanes only (padded lanes excluded via -1e30)
    logits = jnp.where(is_policy, heads, NEG_BIG)
    logits = logits - jnp.max(logits, axis=-1, keepdims=True)
    e = jnp.exp(logits)
    s = jnp.sum(e, axis=-1, keepdims=True)
    r = pl.reciprocal(s, approx=True)
    r = r * (2.0 - s * r)                      # one Newton-Raphson refinement
    policy = e * r

    value = jnp.tanh(heads)                    # only lane A is kept
    reward = jnp.maximum(heads, 0.0)           # only lane A+1 is kept

    packed = jnp.where(
        is_policy, policy,
        jnp.where(lane == action_size, value,
                  jnp.where(lane == action_size + 1, reward, 0.0)))

    hidden_ref[...] = hidden2                  # (TM, 128) lane-dense
    heads_ref[...] = packed                    # (TM, 128) lane-dense


# ----------------------------------------------------------------------------
# One-time parameter preparation (hoisted out of the per-call path)
# ----------------------------------------------------------------------------
def prepare_params(params, action_size):
    """Fold / pack / cast weights once; returns everything the kernel needs."""
    A = int(action_size)
    assert 1 <= A and A + 2 <= HIDDEN, "action_size must fit in the 128-lane head"
    f32, bf16 = jnp.float32, jnp.bfloat16
    S = params["w_r1"].shape[0]

    # fold 1: representation layer-2 into dynamics layer-1 (no activation between)
    w_fold = params["w_r2"] @ params["w_dh"]                       # (64,128) f32
    b_fold = params["b_r2"] @ params["w_dh"] + params["b_d1"]      # (1,128)

    # lane-dense padding of layer 1 to 128 output lanes
    w_r1p = jnp.zeros((S, HIDDEN), f32).at[:, :R1].set(params["w_r1"])
    b_r1p = jnp.zeros((1, HIDDEN), f32).at[:, :R1].set(params["b_r1"])
    w_foldp = jnp.zeros((HIDDEN, HIDDEN), f32).at[:R1, :].set(w_fold)

    # fused heads: one lane-dense (128,128) weight / (1,128) bias
    #   lanes [0,A) policy, lane A value, lane A+1 reward, rest zero
    w_hd = jnp.zeros((HIDDEN, HIDDEN), f32)
    w_hd = w_hd.at[:, :A].set(params["w_p"])
    w_hd = w_hd.at[:, A].set(params["w_v"][:, 0])
    w_hd = w_hd.at[:, A + 1].set(params["w_rw"][:, 0])
    b_hd = jnp.zeros((1, HIDDEN), f32)
    b_hd = b_hd.at[:, :A].set(params["b_p"])
    b_hd = b_hd.at[:, A].set(params["b_v"][:, 0])
    b_hd = b_hd.at[:, A + 1].set(params["b_rw"][:, 0])

    # fold 2: dynamics layer-2 fused with the heads into one (128,256) matmul
    w_cat = jnp.concatenate([params["w_d2"], params["w_d2"] @ w_hd], axis=1)
    b_cat = jnp.concatenate([params["b_d2"], params["b_d2"] @ w_hd + b_hd], axis=1)

    weights = (
        w_r1p.astype(bf16), b_r1p,
        w_foldp.astype(bf16), params["w_da"].astype(f32), b_fold,
        w_cat.astype(bf16), b_cat,
    )
    return {"action_size": A, "state_size": S, "weights": weights}


# ----------------------------------------------------------------------------
# Wrapper (per-call work: batch padding + pallas_call only)
# ----------------------------------------------------------------------------
def muzero_forward(state, action, prep, *, tm=1024):
    """state: (B, S) f32, action: (B, 1) f32, prep: output of prepare_params.

    Returns (policy (B,A), value (B,1), hidden_state (B,128), reward (B,1)).
    """
    A = prep["action_size"]
    weights = prep["weights"]
    B, S = state.shape

    # ---- batch tiling ------------------------------------------------------
    bp = _round_up(B, 8)
    if bp <= 8:
        tm_eff = bp                            # tiny batch: one exact tile
    elif bp <= 2 * tm:
        tm_eff = _round_up(-(-bp // 2), 8)     # 2 tiles -> both v7x TensorCores
        bp = 2 * tm_eff
    else:
        tm_eff = tm
        bp = _round_up(bp, tm)
    pad = bp - B
    if pad:
        state = jnp.pad(state, ((0, pad), (0, 0)))
        action = jnp.pad(action, ((0, pad), (0, 0)))
    grid = (bp // tm_eff,)

    def act_spec(feat):                        # tiled over the batch axis
        return pl.BlockSpec((tm_eff, feat), lambda i: (i, 0))

    def w_spec(arr):                           # resident: same block every step
        return pl.BlockSpec(arr.shape, lambda i: (0, 0))

    in_specs = [act_spec(S), act_spec(1)] + [w_spec(w) for w in weights]
    out_specs = (act_spec(HIDDEN), act_spec(HIDDEN))
    out_shape = (
        jax.ShapeDtypeStruct((bp, HIDDEN), jnp.float32),   # hidden2 slab
        jax.ShapeDtypeStruct((bp, HIDDEN), jnp.float32),   # packed heads slab
    )

    # advisory cost estimate so XLA schedules surrounding ops sensibly
    weight_bytes = sum(int(w.size) * w.dtype.itemsize for w in weights)
    flops = 2 * bp * (S * HIDDEN + HIDDEN * HIDDEN + HIDDEN * 2 * HIDDEN)
    bytes_accessed = weight_bytes + 4 * bp * (S + 1 + 2 * HIDDEN)
    transcendentals = bp * 2 * HIDDEN

    hidden2, heads = pl.pallas_call(
        functools.partial(_muzero_kernel, action_size=A),
        out_shape=out_shape,
        grid=grid,
        in_specs=in_specs,
        out_specs=out_specs,
        compiler_params=pltpu.CompilerParams(
            dimension_semantics=("parallel",),
            vmem_limit_bytes=32 << 20,
        ),
        cost_estimate=pl.CostEstimate(
            flops=flops,
            transcendentals=transcendentals,
            bytes_accessed=bytes_accessed,
        ),
    )(state, action, *weights)

    policy = heads[:B, :A]
    value = heads[:B, A:A + 1]
    reward = heads[:B, A + 1:A + 2]
    hidden_state = hidden2[:B]
    return policy, value, hidden_state, reward


# ----------------------------------------------------------------------------
# Deterministic parameter init (PyTorch Linear style: U(-1/sqrt(fan_in), ...))
# ----------------------------------------------------------------------------
def init_params(key, state_size, action_size):
    def linear(key, fan_in, fan_out):
        k = 1.0 / jnp.sqrt(jnp.float32(fan_in))
        kw, kb = jax.random.split(key)
        w = jax.random.uniform(kw, (fan_in, fan_out), jnp.float32, -k, k)
        b = jax.random.uniform(kb, (1, fan_out), jnp.float32, -k, k)
        return w, b

    keys = jax.random.split(key, 8)
    params = {}
    # representation
    params["w_r1"], params["b_r1"] = linear(keys[0], state_size, R1)
    params["w_r2"], params["b_r2"] = linear(keys[1], R1, HIDDEN)
    # dynamics_state: Linear(129,128) split into hidden part (128) + action row (1)
    w_d1_full, params["b_d1"] = linear(keys[2], HIDDEN + 1, HIDDEN)
    params["w_dh"] = w_d1_full[:HIDDEN, :]
    params["w_da"] = w_d1_full[HIDDEN:HIDDEN + 1, :]          # (1, 128)
    params["w_d2"], params["b_d2"] = linear(keys[3], HIDDEN, HIDDEN)
    # dynamics_reward
    params["w_rw"], params["b_rw"] = linear(keys[4], HIDDEN, 1)
    # prediction heads
    params["w_p"], params["b_p"] = linear(keys[5], HIDDEN, action_size)
    params["w_v"], params["b_v"] = linear(keys[6], HIDDEN, 1)
    return params


# ----------------------------------------------------------------------------
# Pure-JAX f32 reference (mirrors the torch module, unfolded) for sanity check
# ----------------------------------------------------------------------------
def reference_forward(state, action, p):
    h1 = jnp.maximum(state @ p["w_r1"] + p["b_r1"], 0.0)
    hidden = h1 @ p["w_r2"] + p["b_r2"]
    d1 = jnp.maximum(hidden @ p["w_dh"] + action * p["w_da"] + p["b_d1"], 0.0)
    hidden2 = d1 @ p["w_d2"] + p["b_d2"]
    reward = jnp.maximum(hidden2 @ p["w_rw"] + p["b_rw"], 0.0)
    policy = jax.nn.softmax(hidden2 @ p["w_p"] + p["b_p"], axis=-1)
    value = jnp.tanh(hidden2 @ p["w_v"] + p["b_v"])
    return policy, value, hidden2, reward


if __name__ == "__main__":
    # Small shapes consistent with the module
    B, STATE_SIZE, ACTION_SIZE = 8, 16, 4
    TOL = 3e-2   # bf16 matmul operands vs f32 reference

    key = jax.random.PRNGKey(0)
    k_p, k_s, k_a = jax.random.split(key, 3)

    params = init_params(k_p, STATE_SIZE, ACTION_SIZE)
    prep = prepare_params(params, ACTION_SIZE)   # one-time weight folding/packing

    state = jax.random.normal(k_s, (B, STATE_SIZE), jnp.float32)
    action = jax.random.randint(k_a, (B, 1), 0, ACTION_SIZE).astype(jnp.float32)

    policy, value, hidden, reward = muzero_forward(state, action, prep)
    jax.block_until_ready((policy, value, hidden, reward))

    rp, rv, rh, rr = reference_forward(state, action, params)
    assert jnp.allclose(policy, rp, atol=TOL), "policy mismatch"
    assert jnp.allclose(value, rv, atol=TOL), "value mismatch"
    assert jnp.allclose(hidden, rh, atol=TOL), "hidden mismatch"
    assert jnp.allclose(reward, rr, atol=TOL), "reward mismatch"

    # second check: batch needing padding -> exercises grid=(2,) + 2-TC split
    B2 = 300
    k_s2, k_a2 = jax.random.split(jax.random.PRNGKey(1))
    state2 = jax.random.normal(k_s2, (B2, STATE_SIZE), jnp.float32)
    action2 = jax.random.randint(k_a2, (B2, 1), 0, ACTION_SIZE).astype(jnp.float32)
    p2, v2, h2, r2 = muzero_forward(state2, action2, prep)
    jax.block_until_ready((p2, v2, h2, r2))
    rp2, rv2, rh2, rr2 = reference_forward(state2, action2, params)
    assert jnp.allclose(p2, rp2, atol=TOL), "policy mismatch (grid)"
    assert jnp.allclose(v2, rv2, atol=TOL), "value mismatch (grid)"
    assert jnp.allclose(h2, rh2, atol=TOL), "hidden mismatch (grid)"
    assert jnp.allclose(r2, rr2, atol=TOL), "reward mismatch (grid)"

    print("KERNEL_OK")
</pallas_src>

<mosaic_0001>
module attributes {stable_mosaic.version = 11 : i64} {
  func.func @_muzero_kernel(%arg0: i32, %arg1: memref<8x16xf32, #tpu.memory_space<vmem>>, %arg2: memref<8x1xf32, #tpu.memory_space<vmem>>, %arg3: memref<16x128xbf16, #tpu.memory_space<vmem>>, %arg4: memref<1x128xf32, #tpu.memory_space<vmem>>, %arg5: memref<128x128xbf16, #tpu.memory_space<vmem>>, %arg6: memref<1x128xf32, #tpu.memory_space<vmem>>, %arg7: memref<1x128xf32, #tpu.memory_space<vmem>>, %arg8: memref<128x256xbf16, #tpu.memory_space<vmem>>, %arg9: memref<1x256xf32, #tpu.memory_space<vmem>>, %arg10: memref<8x128xf32, #tpu.memory_space<vmem>>, %arg11: memref<8x128xf32, #tpu.memory_space<vmem>>) attributes {dimension_semantics = [#tpu.dimension_semantics<parallel>], iteration_bounds = array<i64: 1>, scalar_prefetch = 0 : i64, scratch_operands = 0 : i64, tpu.core_type = #tpu.core_type<tc>, window_params = [{transform_indices = @transform_0, window_bounds = array<i64: 8, 16>}, {transform_indices = @transform_1, window_bounds = array<i64: 8, 1>}, {pipeline_mode = #tpu.pipeline_mode<synchronous>, transform_indices = @transform_2, window_bounds = array<i64: 16, 128>}, {pipeline_mode = #tpu.pipeline_mode<synchronous>, transform_indices = @transform_3, window_bounds = array<i64: 1, 128>}, {pipeline_mode = #tpu.pipeline_mode<synchronous>, transform_indices = @transform_4, window_bounds = array<i64: 128, 128>}, {pipeline_mode = #tpu.pipeline_mode<synchronous>, transform_indices = @transform_5, window_bounds = array<i64: 1, 128>}, {pipeline_mode = #tpu.pipeline_mode<synchronous>, transform_indices = @transform_6, window_bounds = array<i64: 1, 128>}, {pipeline_mode = #tpu.pipeline_mode<synchronous>, transform_indices = @transform_7, window_bounds = array<i64: 128, 256>}, {pipeline_mode = #tpu.pipeline_mode<synchronous>, transform_indices = @transform_8, window_bounds = array<i64: 1, 256>}, {transform_indices = @transform_9, window_bounds = array<i64: 8, 128>}, {transform_indices = @transform_10, window_bounds = array<i64: 8, 128>}]} {
    %c0 = arith.constant 0 : index
    %c0_0 = arith.constant 0 : index
    %0 = vector.load %arg1[%c0, %c0_0] : memref<8x16xf32, #tpu.memory_space<vmem>>, vector<8x16xf32>
    %1 = arith.truncf %0 : vector<8x16xf32> to vector<8x16xbf16>
    %c0_1 = arith.constant 0 : index
    %c0_2 = arith.constant 0 : index
    %2 = vector.load %arg2[%c0_1, %c0_2] : memref<8x1xf32, #tpu.memory_space<vmem>>, vector<8x1xf32>
    %c0_3 = arith.constant 0 : index
    %c0_4 = arith.constant 0 : index
    %3 = vector.load %arg3[%c0_3, %c0_4] : memref<16x128xbf16, #tpu.memory_space<vmem>>, vector<16x128xbf16>
    %cst = arith.constant dense<0.000000e+00> : vector<8x128xf32>
    %4 = tpu.matmul %1, %3, %cst {dimension_numbers = #tpu.dot_dimension_numbers<[1], [0], [0], [1], [0, 0, 1, 1], [], []>} : vector<8x16xbf16>, vector<16x128xbf16>, vector<8x128xf32> -> vector<8x128xf32>
    %c0_5 = arith.constant 0 : index
    %c0_6 = arith.constant 0 : index
    %5 = vector.load %arg4[%c0_5, %c0_6] : memref<1x128xf32, #tpu.memory_space<vmem>>, vector<1x128xf32>
    %6 = vector.broadcast %5 : vector<1x128xf32> to vector<8x128xf32>
    %7 = arith.addf %4, %6 : vector<8x128xf32>
    %cst_7 = arith.constant 0.000000e+00 : f32
    %8 = vector.broadcast %cst_7 : f32 to vector<8x128xf32>
    %9 = arith.maximumf %7, %8 : vector<8x128xf32>
    %10 = arith.truncf %9 : vector<8x128xf32> to vector<8x128xbf16>
    %c0_8 = arith.constant 0 : index
    %c0_9 = arith.constant 0 : index
    %11 = vector.load %arg5[%c0_8, %c0_9] : memref<128x128xbf16, #tpu.memory_space<vmem>>, vector<128x128xbf16>
    %cst_10 = arith.constant dense<0.000000e+00> : vector<8x128xf32>
    %12 = tpu.matmul %10, %11, %cst_10 {dimension_numbers = #tpu.dot_dimension_numbers<[1], [0], [0], [1], [0, 0, 1, 1], [], []>} : vector<8x128xbf16>, vector<128x128xbf16>, vector<8x128xf32> -> vector<8x128xf32>
    %c0_11 = arith.constant 0 : index
    %c0_12 = arith.constant 0 : index
    %13 = vector.load %arg6[%c0_11, %c0_12] : memref<1x128xf32, #tpu.memory_space<vmem>>, vector<1x128xf32>
    %14 = vector.broadcast %2 : vector<8x1xf32> to vector<8x128xf32>
    %15 = vector.broadcast %13 : vector<1x128xf32> to vector<8x128xf32>
    %16 = arith.mulf %14, %15 : vector<8x128xf32>
    %17 = arith.addf %12, %16 : vector<8x128xf32>
    %c0_13 = arith.constant 0 : index
    %c0_14 = arith.constant 0 : index
    %18 = vector.load %arg7[%c0_13, %c0_14] : memref<1x128xf32, #tpu.memory_space<vmem>>, vector<1x128xf32>
    %19 = vector.broadcast %18 : vector<1x128xf32> to vector<8x128xf32>
    %20 = arith.addf %17, %19 : vector<8x128xf32>
    %cst_15 = arith.constant 0.000000e+00 : f32
    %21 = vector.broadcast %cst_15 : f32 to vector<8x128xf32>
    %22 = arith.maximumf %20, %21 : vector<8x128xf32>
    %23 = arith.truncf %22 : vector<8x128xf32> to vector<8x128xbf16>
    %c0_16 = arith.constant 0 : index
    %c0_17 = arith.constant 0 : index
    %24 = vector.load %arg8[%c0_16, %c0_17] : memref<128x256xbf16, #tpu.memory_space<vmem>>, vector<128x256xbf16>
    %cst_18 = arith.constant dense<0.000000e+00> : vector<8x256xf32>
    %25 = tpu.matmul %23, %24, %cst_18 {dimension_numbers = #tpu.dot_dimension_numbers<[1], [0], [0], [1], [0, 0, 1, 1], [], []>} : vector<8x128xbf16>, vector<128x256xbf16>, vector<8x256xf32> -> vector<8x256xf32>
    %c0_19 = arith.constant 0 : index
    %c0_20 = arith.constant 0 : index
    %26 = vector.load %arg9[%c0_19, %c0_20] : memref<1x256xf32, #tpu.memory_space<vmem>>, vector<1x256xf32>
    %27 = vector.broadcast %26 : vector<1x256xf32> to vector<8x256xf32>
    %28 = arith.addf %25, %27 : vector<8x256xf32>
    %29 = vector.extract_strided_slice %28 {offsets = [0, 0], sizes = [8, 128], strides = [1, 1]} : vector<8x256xf32> to vector<8x128xf32>
    %30 = vector.extract_strided_slice %28 {offsets = [0, 128], sizes = [8, 128], strides = [1, 1]} : vector<8x256xf32> to vector<8x128xf32>
    %31 = tpu.iota {dimensions = array<i32: 1>} : vector<8x128xi32>
    %c4_i32 = arith.constant 4 : i32
    %32 = vector.broadcast %c4_i32 : i32 to vector<8x128xi32>
    %33 = arith.cmpi slt, %31, %32 : vector<8x128xi32>
    %cst_21 = arith.constant -1.000000e+30 : f32
    %34 = vector.broadcast %cst_21 : f32 to vector<8x128xf32>
    %35 = arith.select %33, %30, %34 : vector<8x128xi1>, vector<8x128xf32>
    %cst_22 = arith.constant dense<0xFF800000> : vector<8xf32>
    %36 = vector.multi_reduction <maximumf>, %35, %cst_22 [1] : vector<8x128xf32> to vector<8xf32>
    %37 = vector.shape_cast %36 : vector<8xf32> to vector<8x1xf32>
    %38 = vector.broadcast %37 : vector<8x1xf32> to vector<8x128xf32>
    %39 = arith.subf %35, %38 : vector<8x128xf32>
    %40 = math.exp %39 : vector<8x128xf32>
    %cst_23 = arith.constant dense<0.000000e+00> : vector<8xf32>
    %41 = vector.multi_reduction <add>, %40, %cst_23 [1] : vector<8x128xf32> to vector<8xf32>
    %42 = vector.shape_cast %41 : vector<8xf32> to vector<8x1xf32>
    %43 = tpu.reciprocal %42 {approx = true} : vector<8x1xf32> -> vector<8x1xf32>
    %44 = arith.mulf %42, %43 : vector<8x1xf32>
    %cst_24 = arith.constant 2.000000e+00 : f32
    %45 = vector.broadcast %cst_24 : f32 to vector<8x1xf32>
    %46 = arith.subf %45, %44 : vector<8x1xf32>
    %47 = arith.mulf %43, %46 : vector<8x1xf32>
    %48 = vector.broadcast %47 : vector<8x1xf32> to vector<8x128xf32>
    %49 = arith.mulf %40, %48 : vector<8x128xf32>
    %50 = math.tanh %30 : vector<8x128xf32>
    %cst_25 = arith.constant 0.000000e+00 : f32
    %51 = vector.broadcast %cst_25 : f32 to vector<8x128xf32>
    %52 = arith.maximumf %30, %51 : vector<8x128xf32>
    %c4_i32_26 = arith.constant 4 : i32
    %53 = vector.broadcast %c4_i32_26 : i32 to vector<8x128xi32>
    %54 = arith.cmpi eq, %31, %53 : vector<8x128xi32>
    %c5_i32 = arith.constant 5 : i32
    %55 = vector.broadcast %c5_i32 : i32 to vector<8x128xi32>
    %56 = arith.cmpi eq, %31, %55 : vector<8x128xi32>
    %cst_27 = arith.constant 0.000000e+00 : f32
    %57 = vector.broadcast %cst_27 : f32 to vector<8x128xf32>
    %58 = arith.select %56, %52, %57 : vector<8x128xi1>, vector<8x128xf32>
    %59 = arith.select %54, %50, %58 : vector<8x128xi1>, vector<8x128xf32>
    %60 = arith.select %33, %49, %59 : vector<8x128xi1>, vector<8x128xf32>
    %c0_28 = arith.constant 0 : index
    %c0_29 = arith.constant 0 : index
    %61 = vector.load %arg10[%c0_28, %c0_29] : memref<8x128xf32, #tpu.memory_space<vmem>>, vector<8x128xf32>
    tpu.vector_store %arg10[%c0_28, %c0_29], %29 {strides = array<i32>} : memref<8x128xf32, #tpu.memory_space<vmem>>, vector<8x128xf32>,
    %c0_30 = arith.constant 0 : index
    %c0_31 = arith.constant 0 : index
    %62 = vector.load %arg11[%c0_30, %c0_31] : memref<8x128xf32, #tpu.memory_space<vmem>>, vector<8x128xf32>
    tpu.vector_store %arg11[%c0_30, %c0_31], %60 {strides = array<i32>} : memref<8x128xf32, #tpu.memory_space<vmem>>, vector<8x128xf32>,
    return
  }
  func.func @transform_0(%arg0: i32) -> (i32, i32) {
    %c0_i32 = arith.constant 0 : i32
    %c0_i32_0 = arith.constant 0 : i32
    return %arg0, %c0_i32 : i32, i32
  }
  func.func @transform_1(%arg0: i32) -> (i32, i32) {
    %c0_i32 = arith.constant 0 : i32
    %c0_i32_0 = arith.constant 0 : i32
    return %arg0, %c0_i32 : i32, i32
  }
  func.func @transform_2(%arg0: i32) -> (i32, i32) {
    %c0_i32 = arith.constant 0 : i32
    %c0_i32_0 = arith.constant 0 : i32
    %c0_i32_1 = arith.constant 0 : i32
    return %c0_i32, %c0_i32_0 : i32, i32
  }
  func.func @transform_3(%arg0: i32) -> (i32, i32) {
    %c0_i32 = arith.constant 0 : i32
    %c0_i32_0 = arith.constant 0 : i32
    %c0_i32_1 = arith.constant 0 : i32
    return %c0_i32, %c0_i32_0 : i32, i32
  }
  func.func @transform_4(%arg0: i32) -> (i32, i32) {
    %c0_i32 = arith.constant 0 : i32
    %c0_i32_0 = arith.constant 0 : i32
    %c0_i32_1 = arith.constant 0 : i32
    return %c0_i32, %c0_i32_0 : i32, i32
  }
  func.func @transform_5(%arg0: i32) -> (i32, i32) {
    %c0_i32 = arith.constant 0 : i32
    %c0_i32_0 = arith.constant 0 : i32
    %c0_i32_1 = arith.constant 0 : i32
    return %c0_i32, %c0_i32_0 : i32, i32
  }
  func.func @transform_6(%arg0: i32) -> (i32, i32) {
    %c0_i32 = arith.constant 0 : i32
    %c0_i32_0 = arith.constant 0 : i32
    %c0_i32_1 = arith.constant 0 : i32
    return %c0_i32, %c0_i32_0 : i32, i32
  }
  func.func @transform_7(%arg0: i32) -> (i32, i32) {
    %c0_i32 = arith.constant 0 : i32
    %c0_i32_0 = arith.constant 0 : i32
    %c0_i32_1 = arith.constant 0 : i32
    return %c0_i32, %c0_i32_0 : i32, i32
  }
  func.func @transform_8(%arg0: i32) -> (i32, i32) {
    %c0_i32 = arith.constant 0 : i32
    %c0_i32_0 = arith.constant 0 : i32
    %c0_i32_1 = arith.constant 0 : i32
    return %c0_i32, %c0_i32_0 : i32, i32
  }
  func.func @transform_9(%arg0: i32) -> (i32, i32) {
    %c0_i32 = arith.constant 0 : i32
    %c0_i32_0 = arith.constant 0 : i32
    return %arg0, %c0_i32 : i32, i32
  }
  func.func @transform_10(%arg0: i32) -> (i32, i32) {
    %c0_i32 = arith.constant 0 : i32
    %c0_i32_0 = arith.constant 0 : i32
    return %arg0, %c0_i32 : i32, i32
  }
}

</mosaic_0001>

<bundles_post_ra>
// kernel: tpu_custom_call.1
= control target key start
LH: loop header
LB: loop body
LE: loop exit
PB: predicated region body
PF: predicated region fallthrough
CT: control target
= control target key end

     0   :  { %16 = vsyncpa [#allocation3], 0  ;;  %s801_s0 = inlined_call_operand.vmem [shape: f32[8,16], index: 0, kind: input, shape index: {}]   ;;  %s802_s1 = inlined_call_operand.vmem [shape: f32[8,1], index: 1, kind: input, shape index: {}]   ;;  %s803_s2 = inlined_call_operand.hbm [shape: bf16[16,128], index: 2, kind: input, shape index: {}]   ;;  %s804_s3 = inlined_call_operand.vmem [shape: f32[1,128], index: 3, kind: input, shape index: {}]   ;;  %s805_s4 = inlined_call_operand.hbm [shape: bf16[128,128], index: 4, kind: input, shape index: {}]   ;;  %s806_s5 = inlined_call_operand.vmem [shape: f32[1,128], index: 5, kind: input, shape index: {}]   ;;  %s807_s6 = inlined_call_operand.vmem [shape: f32[1,128], index: 6, kind: input, shape index: {}]   ;;  %s808_s7 = inlined_call_operand.hbm [shape: bf16[128,256], index: 7, kind: input, shape index: {}]   ;;  %s809_s8 = inlined_call_operand.vmem [shape: f32[1,256], index: 8, kind: input, shape index: {}]   ;;  %s810_s9 = inlined_call_operand.hbm [shape: f32[8,128], index: 9, kind: output, shape index: {0}]   ;;  %s811_s10 = inlined_call_operand.hbm [shape: f32[8,128], index: 10, kind: output, shape index: {1}]  }
   0x1   :  { %17 = vsyncpa [#allocation6], 0 }
   0x2   :  { %18 = vsyncpa [#allocation4], 0 }
   0x3   :  { %19 = vsyncpa [#allocation10], 0  ;;  %s699_s13 = smov [#allocation5]   ;;  %s700_s15 = smov [#allocation2]  }
   0x4   :  { %s43_s14 = sshll.u32 %s699_s13, 4  ;;  %s29_s16 = sshll.u32 %s700_s15, 4  ;;  %s44_s14 = int_to_ptr.vmem [resolvable:$true] %s43_s14  ;;  %s30_s16 = int_to_ptr.vmem [resolvable:$true] %s29_s16 }
   0x5   :  { %s599_s17 = scalar_lea.vmem %s44_s14, 1024  ;;  %p604_p1 = scmp.lt.s32.totalorder %s44_s14, %s44_s14 }
   0x6   :  { %p600_p0 = scmp.ne.s32.totalorder %s44_s14, %s599_s17  ;;  %p605_p2 = scmp.lt.s32.totalorder %s599_s17, %s599_s17 }
   0x8   :  { %p606_p3 = por %p605_p2, %p604_p1 }
   0xa   :  { %p607_p4 = pnand %p606_p3, %p600_p0 }
   0xc   :  { %610 = shalt.err (!%p607_p4)
}
   0xd   :  { %s701_s18 = smov 64   ;;  %s702_s19 = smov 4  }
   0xe   :  { %49 = dma.hbm_to_vmem [thread:$0]  %s805_s4, 1024, %s44_s14, [#allocation6], %s701_s18, %s701_s18, %s702_s19  }
   0xf   :  { %s619_s22 = scalar_lea.vmem %s30_s16, 128  ;;  %p624_p6 = scmp.lt.s32.totalorder %s30_s16, %s30_s16 }
  0x10   :  { %p620_p5 = scmp.ne.s32.totalorder %s30_s16, %s619_s22  ;;  %p625_p7 = scmp.lt.s32.totalorder %s619_s22, %s619_s22 }
  0x12   :  { %p626_p8 = por %p625_p7, %p624_p6 }
  0x14   :  { %p627_p9 = pnand %p626_p8, %p620_p5 }
  0x16   :  { %630 = shalt.err (!%p627_p9)
}
  0x17   :  { %35 = dma.hbm_to_vmem [thread:$0]  %s803_s2, 128, %s30_s16, [#allocation3], %s701_s18, %s701_s18, %s702_s19  }
  0x18   :  { %s703_s25 = smov [#allocation7]  }
  0x19   :  { %s59_s26 = sshll.u32 %s703_s25, 4  ;;  %s60_s26 = int_to_ptr.vmem [resolvable:$true] %s59_s26 }
  0x1a   :  { %s639_s27 = scalar_lea.vmem %s60_s26, 2048  ;;  %p644_p11 = scmp.lt.s32.totalorder %s60_s26, %s60_s26 }
  0x1b   :  { %p640_p10 = scmp.ne.s32.totalorder %s60_s26, %s639_s27  ;;  %p645_p12 = scmp.lt.s32.totalorder %s639_s27, %s639_s27 }
  0x1d   :  { %p646_p13 = por %p645_p12, %p644_p11 }
  0x1f   :  { %p647_p0 = pnand %p646_p13, %p640_p10 }
  0x21   :  { %650 = shalt.err (!%p647_p0)
}
  0x22   :  { %s704_s4 = smov 128   ;;  %s705_s28 = smov 8  }
  0x23   :  { %65 = dma.hbm_to_vmem [thread:$0]  %s808_s7, 2048, %s60_s26, [#allocation6], %s704_s4, %s704_s4, %s705_s28  }
  0x24   :  { %691 = dma.done.wait [#allocation3], 128  }
  0x25   :  { %692 = vsyncadd [#allocation3], 4294967168 }
  0x26   :  { %693 = dma.done.wait [#allocation6], 3072  }
  0x27   :  { %694 = vsyncadd [#allocation6], 4294964224  ;;  %v706_v0 = vmov 0.0   ;;  %vm707_vm0 = vmmov 0   ;;  %v552_v1 = vld [vmem:[#allocation2] sm:$0xff]   ;;  %vm96_vm1 = vcmask 130048   ;;  %v287_v50 = vlaneseq }
  0x28   :  { %513 = vmatprep.subr.bf16.mxu0 %v706_v0  ;;  %515 = vmatprep.mubr.msk.bf16.mxu0 %vm707_vm0, %v706_v0  ;;  %v78_v2 = vld [vmem:[%s801_s0] sm:$0xff]  ;;  %v554_v5 = vld [vmem:[#allocation5 + $0x30] sm:$0xff]   ;;  %v555_v6 = vld [vmem:[#allocation5 + $0x28] sm:$0xff]   ;;  %v708_v15 = vmov 0  }
  0x29   :  { %519 = vmatprep.subr.bf16.mxu1 %v706_v0  ;;  %535 = vmatprep.mubr.msk.bf16.mxu1 %vm707_vm0, %v706_v0  ;;  %v79_v3 = vpack.c.bf16 %v78_v2, %v78_v2  ;;  %v553_v4 = vld [vmem:[#allocation5 + $0x38] sm:$0xff]   ;;  %v556_v7 = vld [vmem:[#allocation5 + $0x20] sm:$0xff]   ;;  %v558_v9 = vld [vmem:[#allocation5 + $0x10] sm:$0xff]   ;;  %v288_v51 = vshrl.u32 %v287_v50, 7  ;;  %v419_v56 = vand.u32 127, %v287_v50 }
  0x2a   :  { %514 = vmatpush3.bf16.msra.mxu0 %v552_v1  ;;  %520 = vmatpush3.bf16.msra.mxu1 %v553_v4  ;;  %v557_v8 = vld [vmem:[#allocation5 + $0x18] sm:$0xff]   ;;  %v559_v10 = vld [vmem:[#allocation5 + $0x8] sm:$0xff]   ;;  %v560_v11 = vld [vmem:[#allocation5] sm:$0xff]  }
  0x2b   :  { %521 = vmatprep.subr.bf16.mxu1 %v706_v0  ;;  %v80_v12 = vld [vmem:[%s802_s1] sm:$0xff]  ;;  %551 = vset.pattern.permute.xlu0 %v708_v15  ;;  %v566_v16 = vld [vmem:[#allocation7 + $0x64] ss:$8 sps:$4 sm:$0xff]   ;;  %v564_v17 = vld [vmem:[#allocation7 + $0x60] ss:$8 sps:$4 sm:$0xff]   ;;  %v289_v52 = vsub.s32 0, %v288_v51 }
  0x2c   :  { %v561_v13 = vld [vmem:[#allocation7 + $0x70] ss:$8 sps:$4 sm:$0xff]   ;;  %v563_v14 = vld [vmem:[#allocation7 + $0x74] ss:$8 sps:$4 sm:$0xff]   ;;  %161 = vperm.xlu0 %551, %v80_v12   ;;  %v572_v20 = vld [vmem:[#allocation7 + $0x44] ss:$8 sps:$4 sm:$0xff]  }
  0x2d   :  { %516 = vmatmul.mubr.msk.bf16.vlgmr.msra.gmra.mxu0 %vm96_vm1, %v79_v3  ;;  %377 = vmatprep.subr.bf16.mxu0 %v563_v14  ;;  %v569_v18 = vld [vmem:[#allocation7 + $0x54] ss:$8 sps:$4 sm:$0xff]   ;;  %v567_v19 = vld [vmem:[#allocation7 + $0x50] ss:$8 sps:$4 sm:$0xff]   ;;  %v570_v21 = vld [vmem:[#allocation7 + $0x40] ss:$8 sps:$4 sm:$0xff]  }
  0x2e   :  { %522 = vmatpush3.bf16.msra.mxu1 %v554_v5  ;;  %409 = vmatprep.mubr.bf16.mxu0 %v708_v15  ;;  %v575_v22 = vld [vmem:[#allocation7 + $0x34] ss:$8 sps:$4 sm:$0xff]   ;;  %v573_v23 = vld [vmem:[#allocation7 + $0x30] ss:$8 sps:$4 sm:$0xff]   ;;  %v578_v24 = vld [vmem:[#allocation7 + $0x24] ss:$8 sps:$4 sm:$0xff]  }
  0x2f   :  { %523 = vmatprep.subr.bf16.mxu1 %v706_v0  ;;  %378 = vmatpush1.bf16.msra.mxu0 %v561_v13  ;;  %v576_v25 = vld [vmem:[#allocation7 + $0x20] ss:$8 sps:$4 sm:$0xff]   ;;  %v473_v26 = vld [vmem:[%s804_s3] ss:$0 sm:$0xff]  ;;  %v581_v34 = vld [vmem:[#allocation7 + $0x14] ss:$8 sps:$4 sm:$0xff]  }
  0x30   :  { %379 = vmatprep.subr.bf16.mxu0 %v566_v16  ;;  %v579_v35 = vld [vmem:[#allocation7 + $0x10] ss:$8 sps:$4 sm:$0xff]   ;;  %v584_v36 = vld [vmem:[#allocation7 + $0x4] ss:$8 sps:$4 sm:$0xff]   ;;  %v582_v37 = vld [vmem:[#allocation7] ss:$8 sps:$4 sm:$0xff]  }
  0x31   :  { %v476_v38 = vld [vmem:[%s806_s5] ss:$0 sm:$0xff]  ;;  %v293_v54 = vsub.s32 1, %v288_v51  ;;  %vm420_vm2 = vcmp.lt.s32.totalorder %v419_v56, 4  ;;  %vm437_vm3 = vcmp.eq.s32.totalorder %v419_v56, 5  ;;  %vm436_vm4 = vcmp.eq.s32.totalorder %v419_v56, 4 }
  0x32   :  { %524 = vmatpush3.bf16.msra.mxu1 %v555_v6  ;;  %v485_v42 = vld [vmem:[%s807_s6] ss:$0 sm:$0xff]  ;;  %s709_s6 = smov [#allocation8]  }
  0x33   :  { %525 = vmatprep.subr.bf16.mxu1 %v706_v0  ;;  %380 = vmatpush1.bf16.msra.mxu0 %v564_v17  ;;  %v285_v53 = vld [vmem:[%s809_s8] sm:$0x3]  ;;  %s449_s8 = sshll.u32 %s709_s6, 4  ;;  %s450_s8 = int_to_ptr.vmem [resolvable:$true] %s449_s8 }
  0x34   :  { %381 = vmatprep.subr.bf16.mxu0 %v569_v18  ;;  %v290_v55 = vrot.slane %v285_v53, %v289_v52  ;;  %v294_v57 = vrot.slane %v285_v53, %v293_v54  ;;  %s651_s17 = scalar_lea.vmem %s450_s8, 128  ;;  %p656_p2 = scmp.lt.s32.totalorder %s450_s8, %s450_s8 }
  0x35   :  { %p652_p1 = scmp.ne.s32.totalorder %s450_s8, %s651_s17  ;;  %p657_p3 = scmp.lt.s32.totalorder %s651_s17, %s651_s17 }
  0x36   :  { %526 = vmatpush3.bf16.msra.mxu1 %v556_v7 }
  0x37   :  { %527 = vmatprep.subr.bf16.mxu1 %v706_v0  ;;  %382 = vmatpush1.bf16.msra.mxu0 %v567_v19  ;;  %p658_p4 = por %p657_p3, %p656_p2 }
  0x38   :  { %383 = vmatprep.subr.bf16.mxu0 %v572_v20 }
  0x39   :  { %p659_p5 = pnand %p658_p4, %p652_p1 }
  0x3a   :  { %528 = vmatpush3.bf16.msra.mxu1 %v557_v8 }
  0x3b   :  { %529 = vmatprep.subr.bf16.mxu1 %v706_v0  ;;  %384 = vmatpush1.bf16.msra.mxu0 %v570_v21 }
  0x3c   :  { %385 = vmatprep.subr.bf16.mxu0 %v575_v22 }
  0x3e   :  { %530 = vmatpush3.bf16.msra.mxu1 %v558_v9 }
  0x3f   :  { %531 = vmatprep.subr.bf16.mxu1 %v706_v0  ;;  %386 = vmatpush1.bf16.msra.mxu0 %v573_v23 }
  0x40   :  { %387 = vmatprep.subr.bf16.mxu0 %v578_v24 }
  0x42   :  { %532 = vmatpush3.bf16.msra.mxu1 %v559_v10 }
  0x43   :  { %533 = vmatprep.subr.bf16.mxu1 %v706_v0  ;;  %388 = vmatpush1.bf16.msra.mxu0 %v576_v25 }
  0x44   :  { %389 = vmatprep.subr.bf16.mxu0 %v581_v34 }
  0x46   :  { %534 = vmatpush3.bf16.msra.mxu1 %v560_v11 }
  0x47   :  { %390 = vmatpush1.bf16.msra.mxu0 %v579_v35 }
  0x48   :  { %391 = vmatprep.subr.bf16.mxu0 %v584_v36 }
  0x4b   :  { %392 = vmatpush1.bf16.msra.mxu0 %v582_v37 }
  0xa7   :  { %v162_v39 = vpop.permute.xlu0 %161 }
  0xa8   :  { %v170_v40 = vmul.f32 %v476_v38, %v162_v39 }
  0xed   :  { %v134_v27 = vpop.f32.mrf.mxu0 }
  0xee   :  { %v135_v28 = vadd.f32 %v473_v26, %v134_v27 }
  0xef   :  { %v517_v29 = vpop.f32.mrf.mxu0 }
  0xf0   :  { %v140_v30 = vmax.f32 %v135_v28, 0.0 }
  0xf1   :  { %v137_v31 = vpop.f32.mrf.mxu0 }
  0xf2   :  { %v141_v32 = vpack.c.bf16 %v140_v30, %v140_v30 }
  0xf3   :  { %v518_v33 = vpop.f32.mrf.mxu0 }
  0xf4   :  { %536 = vmatmul.mubr.bf16.vlgmr.msra.gmra.mxu1 %v141_v32 }
 0x1b4   :  { %v253_v41 = vpop.f32.mrf.mxu1 }
 0x1b5   :  { %v254_v43 = vadd.f32 %v253_v41, %v170_v40 }
 0x1b6   :  { %v537_v44 = vpop.f32.mrf.mxu1 }
 0x1b7   :  { %v266_v45 = vadd.f32 %v485_v42, %v254_v43 }
 0x1b8   :  { %v256_v46 = vpop.f32.mrf.mxu1 }
 0x1b9   :  { %v267_v47 = vmax.f32 %v266_v45, 0.0 }
 0x1ba   :  { %v538_v48 = vpop.f32.mrf.mxu1 }
 0x1bb   :  { %v268_v49 = vpack.c.bf16 %v267_v47, %v267_v47 }
 0x1bd   :  { %410 = vmatmul.mubr.bf16.vlgmr.msra.gmra.mxu0 %v268_v49 }
 0x27d   :  { %v411_v58 = vpop.f32.mrf.mxu0 }
 0x27e   :  { %v412_v59 = vadd.f32 %v411_v58, %v290_v55 }
 0x27f   :  { %v413_v60 = vpop.f32.mrf.mxu0 }
 0x280   :  { %441 = vst [vmem:[#allocation8] sm:$0xff] %v412_v59  ;;  %v414_v61 = vadd.f32 %v413_v60, %v294_v57 }
 0x281   :  { %v415_v62 = vpop.f32.mrf.mxu0 }
 0x282   :  { %585 = vtanh.f32 %v414_v61  ;;  %v435_v63 = vmax.f32 %v414_v61, 0.0  ;;  %v421_v0 = vsel %vm420_vm2, %v414_v61, -1e+30 }
 0x283   :  { %v416_v1 = vpop.f32.mrf.mxu0  ;;  %422 = vmax.xlane.f32.xlu0 %v421_v0 }
 0x284   :  { %v438_v2 = vsel %vm437_vm3, %v435_v63, 0.0 }
 0x28f   :  { %v586_v3 = vpop.eup %585 }
 0x290   :  { %v439_v4 = vsel %vm436_vm4, %v586_v3, %v438_v2 }
 0x30c   :  { %v423_v5 = vpop.xlane.xlu0 %422 }
 0x30d   :  { %v424_v6 = vsub.f32 %v421_v0, %v423_v5 }
 0x30f   :  { %v425_v7 = vmul.f32 1.442695, %v424_v6 }
 0x311   :  { %587 = vpow2.f32 %v425_v7 }
 0x31e   :  { %v588_v8 = vpop.eup %587 }
 0x31f   :  { %427 = vadd.xlane.f32.xlu1 %v588_v8 }
 0x320   :  { %662 = shalt.err (!%p659_p5)
}
 0x321   :  { %452 = dma.vmem_to_hbm [thread:$0]  %s450_s8, 128, %s810_s9, [#allocation4]  }
 0x322   :  { %s710_s20 = smov [#allocation9]  }
 0x323   :  { %s459_s21 = sshll.u32 %s710_s20, 4  ;;  %s460_s21 = int_to_ptr.vmem [resolvable:$true] %s459_s21 }
 0x324   :  { %s671_s22 = scalar_lea.vmem %s460_s21, 128  ;;  %p676_p7 = scmp.lt.s32.totalorder %s460_s21, %s460_s21 }
 0x325   :  { %p672_p6 = scmp.ne.s32.totalorder %s460_s21, %s671_s22  ;;  %p677_p8 = scmp.lt.s32.totalorder %s671_s22, %s671_s22 }
 0x327   :  { %p678_p9 = por %p677_p8, %p676_p7 }
 0x329   :  { %p679_p10 = pnand %p678_p9, %p672_p6 }
 0x3a8   :  { %v428_v9 = vpop.xlane.xlu1 %427 }
 0x3a9   :  { %589 = vrcp.f32 %v428_v9 }
 0x3b6   :  { %v590_v10 = vpop.eup %589 }
 0x3b7   :  { %v430_v11 = vmul.f32 %v590_v10, %v428_v9 }
 0x3b9   :  { %v431_v12 = vsub.f32 2.0, %v430_v11 }
 0x3bb   :  { %v432_v13 = vmul.f32 %v590_v10, %v431_v12 }
 0x3bd   :  { %v433_v14 = vmul.f32 %v588_v8, %v432_v13 }
 0x3bf   :  { %v440_v15 = vsel %vm420_vm2, %v433_v14, %v439_v4 }
 0x3c0   :  { %442 = vst [vmem:[#allocation9] sm:$0xff] %v440_v15 }
 0x3c1   :  { %682 = shalt.err (!%p679_p10)
}
 0x3c2   :  { %462 = dma.vmem_to_hbm [thread:$0]  %s460_s21, 128, %s811_s10, [#allocation10]  }
 0x3c3   :  { %695 = dma.done.wait [#allocation4], 128  }
 0x3c4   :  { %696 = vsyncadd [#allocation4], 4294967168 }
 0x3c5   :  { %697 = dma.done.wait [#allocation10], 128  }
 0x3c6   :  { %698 = vsyncadd [#allocation10], 4294967168 }
 0x3c7   :  { %469 = vsyncpa [#allocation3], 1 }
 0x3c8   :  { %470 = vsyncpa [#allocation6], 1 }
 0x3c9   :  { %471 = vsyncpa [#allocation4], 1 }
 0x3ca   :  { %472 = vsyncpa [#allocation10], 1 }

</bundles_post_ra>
